<compile_context>
chip_gen: v7x
topology: tpu7x:2x2x1
jax: 0.10.0
libtpu: 0.0.40
codegen_flags: <defaults>
</compile_context>

<pallas_src>
import jax
import jax.numpy as jnp
from jax.experimental import pallas as pl
from jax.experimental.pallas import tpu as pltpu

_INV_SQRT2 = 0.7071067811865476


def _round_up(x, m):
    return ((x + m - 1) // m) * m


def ffn_kernel(x_ref, w1_ref, b1_ref, w2_ref, b2_ref, o_ref):
    # x_ref:  (TM, Dp) bf16   w1_ref: (Dp, TH) bf16   b1_ref: (1, TH) f32
    # w2_ref: (TH, Dp) bf16   b2_ref: (1, Dp)  f32
    # o_ref:  (TM, Dp) f32  -- resident across the h axis, used as the accumulator.
    h_idx = pl.program_id(1)

    # First matmul slab on the MXU (bf16 operands, f32 accumulation).
    h = jnp.dot(x_ref[...], w1_ref[...], preferred_element_type=jnp.float32)
    h = h + b1_ref[...]                                   # f32 bias add
    # Exact (erf-based) GELU in f32 — matches torch.nn.GELU default.
    h = 0.5 * h * (1.0 + jax.lax.erf(h * _INV_SQRT2))
    # Second matmul slab, accumulated directly into the resident f32 output block.
    contrib = jnp.dot(h.astype(w2_ref.dtype), w2_ref[...],
                      preferred_element_type=jnp.float32)

    @pl.when(h_idx == 0)
    def _():
        o_ref[...] = contrib + b2_ref[...]                # init; b2 folded in here

    @pl.when(h_idx > 0)
    def _():
        o_ref[...] += contrib


def _vmem_capacity_bytes():
    try:
        info = pltpu.get_tpu_info()
        cap = getattr(info, "vmem_capacity_bytes", None)
        if cap:
            return int(cap)
    except Exception:
        pass
    return 64 * 1024 * 1024   # conservative fallback (v7x per-TensorCore VMEM)


def feed_forward(x, w1, b1, w2, b2, *, tm_max=1024, th_max=512):
    """y = GELU(x @ w1 + b1) @ w2 + b2.  x: (B, S, D); w1: (D, H); w2: (H, D)."""
    B, S, D = x.shape
    H = w1.shape[1]
    M = B * S

    # ---- tile selection from the device's actual VMEM budget -------------------
    vmem_cap = _vmem_capacity_bytes()
    tile_budget = int(vmem_cap * 0.75)          # headroom for compiler scratch/sems
    vmem_limit = min(int(vmem_cap * 0.9), 128 * 1024 * 1024)

    D_pad = _round_up(D, 128)                   # lane-dense last dims
    TH = min(th_max, _round_up(H, 128))
    # Shrink the H slab if the (double-buffered) weight slabs alone would eat the
    # VMEM budget for very large D.
    while TH > 128 and 8 * D_pad * TH > tile_budget // 2:
        TH -= 128
    H_pad = _round_up(H, TH)
    M16 = _round_up(M, 16)                      # bf16 sublane packing

    # VMEM model: W1+W2 slabs (bf16, double-buffered) + per-row x(bf16)+out(f32)
    # single-buffered.  Spend whatever is left on TM (arithmetic-intensity lever).
    weight_bytes = 8 * D_pad * TH               # (W1 + W2) * 2B * 2 buffers
    per_row_bytes = D_pad * (2 + 4)             # x bf16 + out f32, single-buffered
    tm_fit = max(16, ((tile_budget - weight_bytes) // per_row_bytes) // 16 * 16)
    TM = min(tm_max, tm_fit, M16)
    if M16 >= 32:
        # Keep >= 2 m-tiles so both v7x TensorCores get work (no-op on v5e/v6e).
        TM = min(TM, _round_up(M16 // 2, 16))
    M_pad = _round_up(M, TM)

    # ---- wrapper-side prep: pad / cast only when actually needed ---------------
    x2d = x.reshape(M, D)
    if M_pad != M or D_pad != D:
        # TODO(synk): the M remainder could be handled by a ragged last block
        # instead of padding; kept as a guarded (usually skipped) pad for clarity.
        x2d = jnp.pad(x2d, ((0, M_pad - M), (0, D_pad - D)))
    w1p = jnp.pad(w1, ((0, D_pad - D), (0, H_pad - H))) if (D_pad != D or H_pad != H) else w1
    w2p = jnp.pad(w2, ((0, H_pad - H), (0, D_pad - D))) if (D_pad != D or H_pad != H) else w2
    b1p = (jnp.pad(b1, (0, H_pad - H)) if H_pad != H else b1).reshape(1, H_pad)
    b2p = (jnp.pad(b2, (0, D_pad - D)) if D_pad != D else b2).reshape(1, D_pad)

    # bf16 matmul operands (no-op if the caller pre-cast weights at load time).
    as_bf16 = lambda a: a if a.dtype == jnp.bfloat16 else a.astype(jnp.bfloat16)
    x_bf, w1_bf, w2_bf = as_bf16(x2d), as_bf16(w1p), as_bf16(w2p)
    b1_f32, b2_f32 = b1p.astype(jnp.float32), b2p.astype(jnp.float32)

    num_m = M_pad // TM
    num_h = H_pad // TH
    grid = (num_m, num_h)

    # HBM traffic: x read once (resident across h); W1/W2 re-streamed per m-tile.
    cost = pl.CostEstimate(
        flops=4 * M_pad * D_pad * H_pad,
        transcendentals=M_pad * H_pad,
        bytes_accessed=(M_pad * D_pad * 2
                        + num_m * (2 * D_pad * H_pad) * 2
                        + num_m * (H_pad + D_pad) * 4
                        + M_pad * D_pad * 4),
    )

    def run(single_buffer_resident):
        resident = ({"pipeline_mode": pl.Buffered(1)} if single_buffer_resident else {})
        grid_spec = pltpu.PrefetchScalarGridSpec(
            num_scalar_prefetch=0,
            grid=grid,
            in_specs=[
                # x tile: resident (single-buffered) across the h reduction axis.
                pl.BlockSpec((TM, D_pad), lambda m, h: (m, 0), **resident),
                # W1 / b1 / W2 slabs march along h -> keep default double-buffering.
                pl.BlockSpec((D_pad, TH), lambda m, h: (0, h)),
                pl.BlockSpec((1, TH), lambda m, h: (0, h)),
                pl.BlockSpec((TH, D_pad), lambda m, h: (h, 0)),
                # b2 never changes: single buffer.
                pl.BlockSpec((1, D_pad), lambda m, h: (0, 0), **resident),
            ],
            # f32 output block doubles as the accumulator (resident across h).
            out_specs=pl.BlockSpec((TM, D_pad), lambda m, h: (m, 0), **resident),
        )
        return pl.pallas_call(
            ffn_kernel,
            out_shape=jax.ShapeDtypeStruct((M_pad, D_pad), jnp.float32),
            grid_spec=grid_spec,
            compiler_params=pltpu.CompilerParams(
                # m axis parallel (megacore on v7x), h is the reduction axis.
                dimension_semantics=("parallel", "arbitrary"),
                vmem_limit_bytes=vmem_limit,
            ),
            cost_estimate=cost,
        )(x_bf, w1_bf, b1_f32, w2_bf, b2_f32)

    try:
        out = run(single_buffer_resident=True)
    except Exception:
        # pipeline_mode=pl.Buffered(1) unsupported on this jax version: fall back
        # to the default double-buffering (same semantics, slightly more VMEM).
        out = run(single_buffer_resident=False)

    out = out[:M, :D].reshape(B, S, D)
    return out if out.dtype == x.dtype else out.astype(x.dtype)


def _reference(x, w1, b1, w2, b2):
    h = jnp.einsum("bsd,dh->bsh", x, w1) + b1
    h = 0.5 * h * (1.0 + jax.lax.erf(h * _INV_SQRT2))
    return jnp.einsum("bsh,hd->bsd", h, w2) + b2


if __name__ == "__main__":
    # Small shapes consistent with FeedForward(dim=32, hidden_dim=64), dropout=0.0.
    B, S, D, H = 2, 8, 32, 64

    key = jax.random.PRNGKey(0)
    kx, k1, k2, k3, k4 = jax.random.split(key, 5)

    x = jax.random.normal(kx, (B, S, D), dtype=jnp.float32)
    w1 = jax.random.normal(k1, (D, H), dtype=jnp.float32) * (1.0 / jnp.sqrt(D))
    b1 = jax.random.normal(k2, (H,), dtype=jnp.float32) * 0.01
    w2 = jax.random.normal(k3, (H, D), dtype=jnp.float32) * (1.0 / jnp.sqrt(H))
    b2 = jax.random.normal(k4, (D,), dtype=jnp.float32) * 0.01

    y = feed_forward(x, w1, b1, w2, b2)
    y = jax.block_until_ready(y)

    # Tolerance loosened because matmul operands are cast to bf16 (MXU path);
    # bias adds / GELU / accumulation remain f32.
    y_ref = _reference(x, w1, b1, w2, b2)
    assert jnp.allclose(y, y_ref, atol=5e-2, rtol=5e-2), "Pallas output mismatch vs reference"

    print("KERNEL_OK")
</pallas_src>

<mosaic_0001>
module attributes {stable_mosaic.version = 11 : i64} {
  func.func @ffn_kernel(%arg0: i32, %arg1: i32, %arg2: memref<16x128xbf16, #tpu.memory_space<vmem>>, %arg3: memref<128x128xbf16, #tpu.memory_space<vmem>>, %arg4: memref<1x128xf32, #tpu.memory_space<vmem>>, %arg5: memref<128x128xbf16, #tpu.memory_space<vmem>>, %arg6: memref<1x128xf32, #tpu.memory_space<vmem>>, %arg7: memref<16x128xf32, #tpu.memory_space<vmem>>) attributes {dimension_semantics = [#tpu.dimension_semantics<parallel>, #tpu.dimension_semantics<arbitrary>], iteration_bounds = array<i64: 1, 1>, scalar_prefetch = 0 : i64, scratch_operands = 0 : i64, tpu.core_type = #tpu.core_type<tc>, window_params = [{pipeline_mode = #tpu.pipeline_mode<synchronous>, transform_indices = @transform_0, window_bounds = array<i64: 16, 128>}, {transform_indices = @transform_1, window_bounds = array<i64: 128, 128>}, {transform_indices = @transform_2, window_bounds = array<i64: 1, 128>}, {transform_indices = @transform_3, window_bounds = array<i64: 128, 128>}, {pipeline_mode = #tpu.pipeline_mode<synchronous>, transform_indices = @transform_4, window_bounds = array<i64: 1, 128>}, {pipeline_mode = #tpu.pipeline_mode<synchronous>, transform_indices = @transform_5, window_bounds = array<i64: 16, 128>}]} {
    %c0 = arith.constant 0 : index
    %c0_0 = arith.constant 0 : index
    %0 = vector.load %arg2[%c0, %c0_0] : memref<16x128xbf16, #tpu.memory_space<vmem>>, vector<16x128xbf16>
    %c0_1 = arith.constant 0 : index
    %c0_2 = arith.constant 0 : index
    %1 = vector.load %arg3[%c0_1, %c0_2] : memref<128x128xbf16, #tpu.memory_space<vmem>>, vector<128x128xbf16>
    %cst = arith.constant dense<0.000000e+00> : vector<16x128xf32>
    %2 = tpu.matmul %0, %1, %cst {dimension_numbers = #tpu.dot_dimension_numbers<[1], [0], [0], [1], [0, 0, 1, 1], [], []>} : vector<16x128xbf16>, vector<128x128xbf16>, vector<16x128xf32> -> vector<16x128xf32>
    %c0_3 = arith.constant 0 : index
    %c0_4 = arith.constant 0 : index
    %3 = vector.load %arg4[%c0_3, %c0_4] : memref<1x128xf32, #tpu.memory_space<vmem>>, vector<1x128xf32>
    %4 = vector.broadcast %3 : vector<1x128xf32> to vector<16x128xf32>
    %5 = arith.addf %2, %4 : vector<16x128xf32>
    %cst_5 = arith.constant 5.000000e-01 : f32
    %6 = vector.broadcast %cst_5 : f32 to vector<16x128xf32>
    %7 = arith.mulf %6, %5 : vector<16x128xf32>
    %cst_6 = arith.constant 0.707106769 : f32
    %8 = vector.broadcast %cst_6 : f32 to vector<16x128xf32>
    %9 = arith.mulf %5, %8 : vector<16x128xf32>
    %10 = math.erf %9 : vector<16x128xf32>
    %cst_7 = arith.constant 1.000000e+00 : f32
    %11 = vector.broadcast %cst_7 : f32 to vector<16x128xf32>
    %12 = arith.addf %11, %10 : vector<16x128xf32>
    %13 = arith.mulf %7, %12 : vector<16x128xf32>
    %14 = arith.truncf %13 : vector<16x128xf32> to vector<16x128xbf16>
    %c0_8 = arith.constant 0 : index
    %c0_9 = arith.constant 0 : index
    %15 = vector.load %arg5[%c0_8, %c0_9] : memref<128x128xbf16, #tpu.memory_space<vmem>>, vector<128x128xbf16>
    %cst_10 = arith.constant dense<0.000000e+00> : vector<16x128xf32>
    %16 = tpu.matmul %14, %15, %cst_10 {dimension_numbers = #tpu.dot_dimension_numbers<[1], [0], [0], [1], [0, 0, 1, 1], [], []>} : vector<16x128xbf16>, vector<128x128xbf16>, vector<16x128xf32> -> vector<16x128xf32>
    %c0_i32 = arith.constant 0 : i32
    %17 = arith.cmpi eq, %arg1, %c0_i32 : i32
    %18 = arith.extui %17 : i1 to i32
    %c0_i32_11 = arith.constant 0 : i32
    %19 = arith.cmpi ne, %18, %c0_i32_11 : i32
    scf.if %19 {
      %c0_14 = arith.constant 0 : index
      %c0_15 = arith.constant 0 : index
      %23 = vector.load %arg6[%c0_14, %c0_15] : memref<1x128xf32, #tpu.memory_space<vmem>>, vector<1x128xf32>
      %24 = vector.broadcast %23 : vector<1x128xf32> to vector<16x128xf32>
      %25 = arith.addf %16, %24 : vector<16x128xf32>
      %c0_16 = arith.constant 0 : index
      %c0_17 = arith.constant 0 : index
      %26 = vector.load %arg7[%c0_16, %c0_17] : memref<16x128xf32, #tpu.memory_space<vmem>>, vector<16x128xf32>
      tpu.vector_store %arg7[%c0_16, %c0_17], %25 {strides = array<i32>} : memref<16x128xf32, #tpu.memory_space<vmem>>, vector<16x128xf32>,
    } else {
    }
    %c0_i32_12 = arith.constant 0 : i32
    %20 = arith.cmpi sgt, %arg1, %c0_i32_12 : i32
    %21 = arith.extui %20 : i1 to i32
    %c0_i32_13 = arith.constant 0 : i32
    %22 = arith.cmpi ne, %21, %c0_i32_13 : i32
    scf.if %22 {
      %c0_14 = arith.constant 0 : index
      %c0_15 = arith.constant 0 : index
      %23 = vector.load %arg7[%c0_14, %c0_15] : memref<16x128xf32, #tpu.memory_space<vmem>>, vector<16x128xf32>
      %24 = arith.addf %23, %16 : vector<16x128xf32>
      %c0_16 = arith.constant 0 : index
      %c0_17 = arith.constant 0 : index
      %25 = vector.load %arg7[%c0_16, %c0_17] : memref<16x128xf32, #tpu.memory_space<vmem>>, vector<16x128xf32>
      tpu.vector_store %arg7[%c0_16, %c0_17], %24 {strides = array<i32>} : memref<16x128xf32, #tpu.memory_space<vmem>>, vector<16x128xf32>,
    } else {
    }
    return
  }
  func.func @transform_0(%arg0: i32, %arg1: i32) -> (i32, i32) {
    %c0_i32 = arith.constant 0 : i32
    %c0_i32_0 = arith.constant 0 : i32
    return %arg0, %c0_i32 : i32, i32
  }
  func.func @transform_1(%arg0: i32, %arg1: i32) -> (i32, i32) {
    %c0_i32 = arith.constant 0 : i32
    %c0_i32_0 = arith.constant 0 : i32
    return %c0_i32, %arg1 : i32, i32
  }
  func.func @transform_2(%arg0: i32, %arg1: i32) -> (i32, i32) {
    %c0_i32 = arith.constant 0 : i32
    %c0_i32_0 = arith.constant 0 : i32
    return %c0_i32, %arg1 : i32, i32
  }
  func.func @transform_3(%arg0: i32, %arg1: i32) -> (i32, i32) {
    %c0_i32 = arith.constant 0 : i32
    %c0_i32_0 = arith.constant 0 : i32
    return %arg1, %c0_i32 : i32, i32
  }
  func.func @transform_4(%arg0: i32, %arg1: i32) -> (i32, i32) {
    %c0_i32 = arith.constant 0 : i32
    %c0_i32_0 = arith.constant 0 : i32
    %c0_i32_1 = arith.constant 0 : i32
    return %c0_i32, %c0_i32_0 : i32, i32
  }
  func.func @transform_5(%arg0: i32, %arg1: i32) -> (i32, i32) {
    %c0_i32 = arith.constant 0 : i32
    %c0_i32_0 = arith.constant 0 : i32
    return %arg0, %c0_i32 : i32, i32
  }
}

module attributes {stable_mosaic.version = 11 : i64} {
  func.func @ffn_kernel(%arg0: i32, %arg1: i32, %arg2: memref<16x128xbf16, #tpu.memory_space<vmem>>, %arg3: memref<128x128xbf16, #tpu.memory_space<vmem>>, %arg4: memref<1x128xf32, #tpu.memory_space<vmem>>, %arg5: memref<128x128xbf16, #tpu.memory_space<vmem>>, %arg6: memref<1x128xf32, #tpu.memory_space<vmem>>, %arg7: memref<16x128xf32, #tpu.memory_space<vmem>>) attributes {dimension_semantics = [#tpu.dimension_semantics<parallel>, #tpu.dimension_semantics<arbitrary>], iteration_bounds = array<i64: 1, 1>, scalar_prefetch = 0 : i64, scratch_operands = 0 : i64, tpu.core_type = #tpu.core_type<tc>, window_params = [{transform_indices = @transform_0, window_bounds = array<i64: 16, 128>}, {transform_indices = @transform_1, window_bounds = array<i64: 128, 128>}, {transform_indices = @transform_2, window_bounds = array<i64: 1, 128>}, {transform_indices = @transform_3, window_bounds = array<i64: 128, 128>}, {pipeline_mode = #tpu.pipeline_mode<synchronous>, transform_indices = @transform_4, window_bounds = array<i64: 1, 128>}, {transform_indices = @transform_5, window_bounds = array<i64: 16, 128>}]} {
    %c0 = arith.constant 0 : index
    %c0_0 = arith.constant 0 : index
    %0 = vector.load %arg2[%c0, %c0_0] : memref<16x128xbf16, #tpu.memory_space<vmem>>, vector<16x128xbf16>
    %c0_1 = arith.constant 0 : index
    %c0_2 = arith.constant 0 : index
    %1 = vector.load %arg3[%c0_1, %c0_2] : memref<128x128xbf16, #tpu.memory_space<vmem>>, vector<128x128xbf16>
    %cst = arith.constant dense<0.000000e+00> : vector<16x128xf32>
    %2 = tpu.matmul %0, %1, %cst {dimension_numbers = #tpu.dot_dimension_numbers<[1], [0], [0], [1], [0, 0, 1, 1], [], []>} : vector<16x128xbf16>, vector<128x128xbf16>, vector<16x128xf32> -> vector<16x128xf32>
    %c0_3 = arith.constant 0 : index
    %c0_4 = arith.constant 0 : index
    %3 = vector.load %arg4[%c0_3, %c0_4] : memref<1x128xf32, #tpu.memory_space<vmem>>, vector<1x128xf32>
    %4 = vector.broadcast %3 : vector<1x128xf32> to vector<16x128xf32>
    %5 = arith.addf %2, %4 : vector<16x128xf32>
    %cst_5 = arith.constant 5.000000e-01 : f32
    %6 = vector.broadcast %cst_5 : f32 to vector<16x128xf32>
    %7 = arith.mulf %6, %5 : vector<16x128xf32>
    %cst_6 = arith.constant 0.707106769 : f32
    %8 = vector.broadcast %cst_6 : f32 to vector<16x128xf32>
    %9 = arith.mulf %5, %8 : vector<16x128xf32>
    %10 = math.erf %9 : vector<16x128xf32>
    %cst_7 = arith.constant 1.000000e+00 : f32
    %11 = vector.broadcast %cst_7 : f32 to vector<16x128xf32>
    %12 = arith.addf %11, %10 : vector<16x128xf32>
    %13 = arith.mulf %7, %12 : vector<16x128xf32>
    %14 = arith.truncf %13 : vector<16x128xf32> to vector<16x128xbf16>
    %c0_8 = arith.constant 0 : index
    %c0_9 = arith.constant 0 : index
    %15 = vector.load %arg5[%c0_8, %c0_9] : memref<128x128xbf16, #tpu.memory_space<vmem>>, vector<128x128xbf16>
    %cst_10 = arith.constant dense<0.000000e+00> : vector<16x128xf32>
    %16 = tpu.matmul %14, %15, %cst_10 {dimension_numbers = #tpu.dot_dimension_numbers<[1], [0], [0], [1], [0, 0, 1, 1], [], []>} : vector<16x128xbf16>, vector<128x128xbf16>, vector<16x128xf32> -> vector<16x128xf32>
    %c0_i32 = arith.constant 0 : i32
    %17 = arith.cmpi eq, %arg1, %c0_i32 : i32
    %18 = arith.extui %17 : i1 to i32
    %c0_i32_11 = arith.constant 0 : i32
    %19 = arith.cmpi ne, %18, %c0_i32_11 : i32
    scf.if %19 {
      %c0_14 = arith.constant 0 : index
      %c0_15 = arith.constant 0 : index
      %23 = vector.load %arg6[%c0_14, %c0_15] : memref<1x128xf32, #tpu.memory_space<vmem>>, vector<1x128xf32>
      %24 = vector.broadcast %23 : vector<1x128xf32> to vector<16x128xf32>
      %25 = arith.addf %16, %24 : vector<16x128xf32>
      %c0_16 = arith.constant 0 : index
      %c0_17 = arith.constant 0 : index
      %26 = vector.load %arg7[%c0_16, %c0_17] : memref<16x128xf32, #tpu.memory_space<vmem>>, vector<16x128xf32>
      tpu.vector_store %arg7[%c0_16, %c0_17], %25 {strides = array<i32>} : memref<16x128xf32, #tpu.memory_space<vmem>>, vector<16x128xf32>,
    } else {
    }
    %c0_i32_12 = arith.constant 0 : i32
    %20 = arith.cmpi sgt, %arg1, %c0_i32_12 : i32
    %21 = arith.extui %20 : i1 to i32
    %c0_i32_13 = arith.constant 0 : i32
    %22 = arith.cmpi ne, %21, %c0_i32_13 : i32
    scf.if %22 {
      %c0_14 = arith.constant 0 : index
      %c0_15 = arith.constant 0 : index
      %23 = vector.load %arg7[%c0_14, %c0_15] : memref<16x128xf32, #tpu.memory_space<vmem>>, vector<16x128xf32>
      %24 = arith.addf %23, %16 : vector<16x128xf32>
      %c0_16 = arith.constant 0 : index
      %c0_17 = arith.constant 0 : index
      %25 = vector.load %arg7[%c0_16, %c0_17] : memref<16x128xf32, #tpu.memory_space<vmem>>, vector<16x128xf32>
      tpu.vector_store %arg7[%c0_16, %c0_17], %24 {strides = array<i32>} : memref<16x128xf32, #tpu.memory_space<vmem>>, vector<16x128xf32>,
    } else {
    }
    return
  }
  func.func @transform_0(%arg0: i32, %arg1: i32) -> (i32, i32) {
    %c0_i32 = arith.constant 0 : i32
    %c0_i32_0 = arith.constant 0 : i32
    return %arg0, %c0_i32 : i32, i32
  }
  func.func @transform_1(%arg0: i32, %arg1: i32) -> (i32, i32) {
    %c0_i32 = arith.constant 0 : i32
    %c0_i32_0 = arith.constant 0 : i32
    return %c0_i32, %arg1 : i32, i32
  }
  func.func @transform_2(%arg0: i32, %arg1: i32) -> (i32, i32) {
    %c0_i32 = arith.constant 0 : i32
    %c0_i32_0 = arith.constant 0 : i32
    return %c0_i32, %arg1 : i32, i32
  }
  func.func @transform_3(%arg0: i32, %arg1: i32) -> (i32, i32) {
    %c0_i32 = arith.constant 0 : i32
    %c0_i32_0 = arith.constant 0 : i32
    return %arg1, %c0_i32 : i32, i32
  }
  func.func @transform_4(%arg0: i32, %arg1: i32) -> (i32, i32) {
    %c0_i32 = arith.constant 0 : i32
    %c0_i32_0 = arith.constant 0 : i32
    %c0_i32_1 = arith.constant 0 : i32
    return %c0_i32, %c0_i32_0 : i32, i32
  }
  func.func @transform_5(%arg0: i32, %arg1: i32) -> (i32, i32) {
    %c0_i32 = arith.constant 0 : i32
    %c0_i32_0 = arith.constant 0 : i32
    return %arg0, %c0_i32 : i32, i32
  }
}

</mosaic_0001>

<bundles_post_ra>
// kernel: tpu_custom_call.1
= control target key start
LH: loop header
LB: loop body
LE: loop exit
PB: predicated region body
PF: predicated region fallthrough
CT: control target
= control target key end

     0   :  { %10 = vsyncpa [#allocation3], 0  ;;  %s654_s0 = inlined_call_operand.hbm [shape: bf16[16,128], index: 0, kind: input, shape index: {}]   ;;  %s655_s1 = inlined_call_operand.hbm [shape: bf16[128,128], index: 1, kind: input, shape index: {}]   ;;  %s656_s2 = inlined_call_operand.vmem [shape: f32[1,128], index: 2, kind: input, shape index: {}]   ;;  %s657_s3 = inlined_call_operand.hbm [shape: bf16[128,128], index: 3, kind: input, shape index: {}]   ;;  %s658_s4 = inlined_call_operand.vmem [shape: f32[1,128], index: 4, kind: input, shape index: {}]   ;;  %s659_s5 = inlined_call_operand.hbm [shape: f32[16,128], index: 5, kind: output, shape index: {}]  }
   0x1   :  { %11 = vsyncpa [#allocation6], 0 }
   0x2   :  { %12 = vsyncpa [#allocation4], 0  ;;  %s544_s18 = smov [#allocation5]   ;;  %s545_s20 = smov [#allocation2]  }
   0x3   :  { %s30_s19 = sshll.u32 %s544_s18, 4  ;;  %s18_s21 = sshll.u32 %s545_s20, 4  ;;  %s31_s19 = int_to_ptr.vmem [resolvable:$true] %s30_s19  ;;  %s584_s21 = int_to_ptr.vmem [resolvable:$true] %s18_s21 }
   0x4   :  { %s450_s24 = scalar_lea.hbm %s655_s1, 1024 }
   0x5   :  { %p451_p0 = scmp.ne.s32.totalorder %s655_s1, %s450_s24  ;;  %p454_p1 = scmp.lt.u32.totalorder %s450_s24, %s655_s1 }
   0x7   :  { %p456_p2 = pnand %p454_p1, %p451_p0 }
   0x9   :  { %459 = shalt.err (!%p456_p2)
}
   0xa   :  { %s460_s29 = scalar_lea.vmem %s31_s19, 1024  ;;  %p465_p4 = scmp.lt.s32.totalorder %s31_s19, %s31_s19 }
   0xb   :  { %p461_p3 = scmp.ne.s32.totalorder %s31_s19, %s460_s29  ;;  %p466_p5 = scmp.lt.s32.totalorder %s460_s29, %s460_s29 }
   0xd   :  { %p467_p6 = por %p466_p5, %p465_p4 }
   0xf   :  { %p468_p7 = pnand %p467_p6, %p461_p3 }
  0x11   :  { %471 = shalt.err (!%p468_p7)
}
  0x12   :  { %s546_s30 = smov 64   ;;  %s547_s6 = smov 4  }
  0x13   :  { %36 = dma.hbm_to_vmem [thread:$0]  %s655_s1, 1024, %s31_s19, [#allocation6], %s546_s30, %s546_s30, %s547_s6  }
  0x14   :  { %s472_s11 = scalar_lea.hbm %s654_s0, 128 }
  0x15   :  { %p473_p8 = scmp.ne.s32.totalorder %s654_s0, %s472_s11  ;;  %p476_p9 = scmp.lt.u32.totalorder %s472_s11, %s654_s0 }
  0x17   :  { %p478_p10 = pnand %p476_p9, %p473_p8 }
  0x19   :  { %481 = shalt.err (!%p478_p10)
}
  0x1a   :  { %s482_s16 = scalar_lea.vmem %s584_s21, 128  ;;  %p487_p12 = scmp.lt.s32.totalorder %s584_s21, %s584_s21 }
  0x1b   :  { %p483_p11 = scmp.ne.s32.totalorder %s584_s21, %s482_s16  ;;  %p488_p13 = scmp.lt.s32.totalorder %s482_s16, %s482_s16 }
  0x1d   :  { %p489_p0 = por %p488_p13, %p487_p12 }
  0x1f   :  { %p490_p1 = pnand %p489_p0, %p483_p11 }
  0x21   :  { %493 = shalt.err (!%p490_p1)
}
  0x22   :  { %24 = dma.hbm_to_vmem [thread:$0]  %s654_s0, 128, %s584_s21, [#allocation3], %s546_s30, %s546_s30, %s547_s6  }
  0x23   :  { %s548_s18 = smov [#allocation7]   ;;  %s494_s23 = scalar_lea.hbm %s657_s3, 1024 }
  0x24   :  { %s44_s19 = sshll.u32 %s548_s18, 4  ;;  %p495_p2 = scmp.ne.s32.totalorder %s657_s3, %s494_s23  ;;  %s45_s19 = int_to_ptr.vmem [resolvable:$true] %s44_s19 }
  0x25   :  { %p498_p3 = scmp.lt.u32.totalorder %s494_s23, %s657_s3 }
  0x27   :  { %p500_p4 = pnand %p498_p3, %p495_p2 }
  0x29   :  { %503 = shalt.err (!%p500_p4)
}
  0x2a   :  { %s504_s28 = scalar_lea.vmem %s45_s19, 1024  ;;  %p509_p6 = scmp.lt.s32.totalorder %s45_s19, %s45_s19 }
  0x2b   :  { %p505_p5 = scmp.ne.s32.totalorder %s45_s19, %s504_s28  ;;  %p510_p7 = scmp.lt.s32.totalorder %s504_s28, %s504_s28 }
  0x2d   :  { %p511_p8 = por %p510_p7, %p509_p6 }
  0x2f   :  { %p512_p9 = pnand %p511_p8, %p505_p5 }
  0x31   :  { %515 = shalt.err (!%p512_p9)
}
  0x32   :  { %50 = dma.hbm_to_vmem [thread:$0]  %s657_s3, 1024, %s45_s19, [#allocation6], %s546_s30, %s546_s30, %s547_s6  }
  0x33   :  { %538 = dma.done.wait [#allocation3], 128  }
  0x34   :  { %539 = vsyncadd [#allocation3], 4294967168 }
  0x35   :  { %540 = dma.done.wait [#allocation6], 2048  }
  0x36   :  { %541 = vsyncadd [#allocation6], 4294965248  ;;  %v549_v0 = vmov 0.0   ;;  %vm550_vm0 = vmmov 0   ;;  %v429_v1 = vld [vmem:[#allocation5] sm:$0xff]   ;;  %v430_v2 = vld [vmem:[#allocation5 + $0x8] sm:$0xff]  }
  0x37   :  { %379 = vmatprep.subr.bf16.mxu0 %v549_v0  ;;  %395 = vmatprep.mubr.msk.bf16.mxu0 %vm550_vm0, %v549_v0  ;;  %v431_v3 = vld [vmem:[#allocation5 + $0x10] sm:$0xff]   ;;  %v438_v4 = vld [vmem:[#allocation7] sm:$0xff]   ;;  %v432_v5 = vld [vmem:[#allocation5 + $0x18] sm:$0xff]   ;;  %s551_s6 = smov [#allocation8]  }
  0x38   :  { %399 = vmatprep.subr.bf16.mxu1 %v549_v0  ;;  %415 = vmatprep.mubr.msk.bf16.mxu1 %vm550_vm0, %v549_v0  ;;  %v439_v6 = vld [vmem:[#allocation7 + $0x8] sm:$0xff]   ;;  %v433_v7 = vld [vmem:[#allocation5 + $0x20] sm:$0xff]   ;;  %v435_v9 = vld [vmem:[#allocation5 + $0x30] sm:$0xff]   ;;  %s329_s7 = sshll.u32 %s551_s6, 4  ;;  %s330_s7 = int_to_ptr.vmem [resolvable:$true] %s329_s7 }
  0x39   :  { %380 = vmatpush3.bf16.msra.mxu0 %v429_v1  ;;  %400 = vmatpush3.bf16.msra.mxu1 %v438_v4  ;;  %v434_v8 = vld [vmem:[#allocation5 + $0x28] sm:$0xff]   ;;  %v436_v10 = vld [vmem:[#allocation5 + $0x38] sm:$0xff]   ;;  %v440_v12 = vld [vmem:[#allocation7 + $0x10] sm:$0xff]   ;;  %s516_s8 = scalar_lea.vmem %s330_s7, 256  ;;  %p521_p11 = scmp.lt.s32.totalorder %s330_s7, %s330_s7 }
  0x3a   :  { %381 = vmatprep.subr.bf16.mxu0 %v549_v0  ;;  %401 = vmatprep.subr.bf16.mxu1 %v549_v0  ;;  %v437_v11 = vld [vmem:[#allocation2] sm:$0xff]   ;;  %v442_v14 = vld [vmem:[#allocation7 + $0x20] sm:$0xff]   ;;  %v443_v15 = vld [vmem:[#allocation7 + $0x28] sm:$0xff]   ;;  %p517_p10 = scmp.ne.s32.totalorder %s330_s7, %s516_s8  ;;  %p522_p12 = scmp.lt.s32.totalorder %s516_s8, %s516_s8 }
  0x3b   :  { %v441_v13 = vld [vmem:[#allocation7 + $0x18] sm:$0xff]   ;;  %v444_v16 = vld [vmem:[#allocation7 + $0x30] sm:$0xff]  }
  0x3c   :  { %v445_v17 = vld [vmem:[#allocation7 + $0x38] sm:$0xff]   ;;  %p523_p13 = por %p522_p12, %p521_p11 }
  0x3d   :  { %382 = vmatpush3.bf16.msra.mxu0 %v430_v2  ;;  %402 = vmatpush3.bf16.msra.mxu1 %v439_v6  ;;  %v342_v18 = vld [vmem:[%s656_s2] ss:$0 sm:$0xff] }
  0x3e   :  { %383 = vmatprep.subr.bf16.mxu0 %v549_v0  ;;  %403 = vmatprep.subr.bf16.mxu1 %v549_v0  ;;  %v360_v36 = vld [vmem:[%s658_s4] ss:$0 sm:$0xff]  ;;  %p524_p0 = pnand %p523_p13, %p517_p10 }
  0x41   :  { %384 = vmatpush3.bf16.msra.mxu0 %v431_v3  ;;  %404 = vmatpush3.bf16.msra.mxu1 %v440_v12 }
  0x42   :  { %385 = vmatprep.subr.bf16.mxu0 %v549_v0  ;;  %405 = vmatprep.subr.bf16.mxu1 %v549_v0 }
  0x45   :  { %386 = vmatpush3.bf16.msra.mxu0 %v432_v5  ;;  %406 = vmatpush3.bf16.msra.mxu1 %v441_v13 }
  0x46   :  { %387 = vmatprep.subr.bf16.mxu0 %v549_v0  ;;  %407 = vmatprep.subr.bf16.mxu1 %v549_v0 }
  0x49   :  { %388 = vmatpush3.bf16.msra.mxu0 %v433_v7  ;;  %408 = vmatpush3.bf16.msra.mxu1 %v442_v14 }
  0x4a   :  { %389 = vmatprep.subr.bf16.mxu0 %v549_v0  ;;  %409 = vmatprep.subr.bf16.mxu1 %v549_v0 }
  0x4d   :  { %390 = vmatpush3.bf16.msra.mxu0 %v434_v8  ;;  %410 = vmatpush3.bf16.msra.mxu1 %v443_v15 }
  0x4e   :  { %391 = vmatprep.subr.bf16.mxu0 %v549_v0  ;;  %411 = vmatprep.subr.bf16.mxu1 %v549_v0 }
  0x51   :  { %392 = vmatpush3.bf16.msra.mxu0 %v435_v9  ;;  %412 = vmatpush3.bf16.msra.mxu1 %v444_v16 }
  0x52   :  { %393 = vmatprep.subr.bf16.mxu0 %v549_v0  ;;  %413 = vmatprep.subr.bf16.mxu1 %v549_v0 }
  0x55   :  { %394 = vmatpush3.bf16.msra.mxu0 %v436_v10  ;;  %414 = vmatpush3.bf16.msra.mxu1 %v445_v17 }
  0x58   :  { %396 = vmatmul.mubr.bf16.vlgmr.msra.gmra.mrb[0].mxu0 %v437_v11 }
 0x12b   :  { %v176_v19 = vpop.f32.mrb[0].mxu0 }
 0x12c   :  { %v177_v20 = vadd.f32 %v342_v18, %v176_v19  ;;  %v397_v21 = vpop.f32.mrb[1].mxu0 }
 0x12d   :  { %v179_v22 = vpop.f32.mrb[2].mxu0 }
 0x12e   :  { %v185_v23 = vmul.f32 0.70710677, %v177_v20  ;;  %v180_v24 = vadd.f32 %v342_v18, %v179_v22  ;;  %v398_v25 = vpop.f32.mrb[3].mxu0  ;;  %v183_v30 = vmul.f32 0.5, %v177_v20 }
 0x130   :  { %446 = verf.f32 %v185_v23  ;;  %v186_v26 = vmul.f32 0.70710677, %v180_v24  ;;  %v184_v31 = vmul.f32 0.5, %v180_v24 }
 0x132   :  { %448 = verf.f32 %v186_v26 }
 0x13a   :  { %v447_v27 = vpop.eup %446 }
 0x13b   :  { %v189_v28 = vadd.f32 1.0, %v447_v27 }
 0x13c   :  { %v449_v29 = vpop.eup %448 }
 0x13d   :  { %v190_v32 = vadd.f32 1.0, %v449_v29  ;;  %v191_v33 = vmul.f32 %v189_v28, %v183_v30 }
 0x13f   :  { %v192_v34 = vmul.f32 %v190_v32, %v184_v31 }
 0x141   :  { %v193_v35 = vpack.c.bf16 %v192_v34, %v191_v33 }
 0x143   :  { %416 = vmatmul.mubr.bf16.vlgmr.msra.gmra.mrb[0].mxu1 %v193_v35 }
 0x216   :  { %v292_v37 = vpop.f32.mrb[0].mxu1 }
 0x217   :  { %v310_v38 = vadd.f32 %v360_v36, %v292_v37  ;;  %v417_v39 = vpop.f32.mrb[1].mxu1 }
 0x218   :  { %v295_v40 = vpop.f32.mrb[2].mxu1 }
 0x219   :  { %312 = vst [vmem:[#allocation8] sm:$0xff] %v310_v38  ;;  %v311_v41 = vadd.f32 %v360_v36, %v295_v40  ;;  %v418_v42 = vpop.f32.mrb[3].mxu1 }
 0x21b   :  { %313 = vst [vmem:[#allocation8 + $0x8] sm:$0xff] %v311_v41 }
 0x21c   :  { %527 = shalt.err (!%p524_p0)
}
 0x21d   :  { %s528_s10 = scalar_lea.hbm %s659_s5, 256 }
 0x21e   :  { %p529_p1 = scmp.ne.s32.totalorder %s659_s5, %s528_s10  ;;  %p532_p2 = scmp.lt.u32.totalorder %s528_s10, %s659_s5 }
 0x220   :  { %p534_p3 = pnand %p532_p2, %p529_p1 }
 0x222   :  { %537 = shalt.err (!%p534_p3)
}
 0x223   :  { %s552_s15 = smov 128   ;;  %s553_s16 = smov 8  }
 0x224   :  { %335 = dma.vmem_to_hbm [thread:$0]  %s330_s7, 256, %s659_s5, [#allocation4], %s552_s15, %s552_s15, %s553_s16  }
 0x225   :  { %542 = dma.done.wait [#allocation4], 256  }
 0x226   :  { %543 = vsyncadd [#allocation4], 4294967040 }
 0x227   :  { %339 = vsyncpa [#allocation3], 1 }
 0x228   :  { %340 = vsyncpa [#allocation6], 1 }
 0x229   :  { %341 = vsyncpa [#allocation4], 1 }

// kernel: tpu_custom_call.1
= control target key start
LH: loop header
LB: loop body
LE: loop exit
PB: predicated region body
PF: predicated region fallthrough
CT: control target
= control target key end

     0   :  { %10 = vsyncpa [#allocation3], 0  ;;  %s654_s0 = inlined_call_operand.hbm [shape: bf16[16,128], index: 0, kind: input, shape index: {}]   ;;  %s655_s1 = inlined_call_operand.hbm [shape: bf16[128,128], index: 1, kind: input, shape index: {}]   ;;  %s656_s2 = inlined_call_operand.vmem [shape: f32[1,128], index: 2, kind: input, shape index: {}]   ;;  %s657_s3 = inlined_call_operand.hbm [shape: bf16[128,128], index: 3, kind: input, shape index: {}]   ;;  %s658_s4 = inlined_call_operand.vmem [shape: f32[1,128], index: 4, kind: input, shape index: {}]   ;;  %s659_s5 = inlined_call_operand.hbm [shape: f32[16,128], index: 5, kind: output, shape index: {}]  }
   0x1   :  { %11 = vsyncpa [#allocation6], 0 }
   0x2   :  { %12 = vsyncpa [#allocation4], 0  ;;  %s544_s18 = smov [#allocation5]   ;;  %s545_s20 = smov [#allocation2]  }
   0x3   :  { %s30_s19 = sshll.u32 %s544_s18, 4  ;;  %s18_s21 = sshll.u32 %s545_s20, 4  ;;  %s31_s19 = int_to_ptr.vmem [resolvable:$true] %s30_s19  ;;  %s584_s21 = int_to_ptr.vmem [resolvable:$true] %s18_s21 }
   0x4   :  { %s450_s24 = scalar_lea.hbm %s655_s1, 1024 }
   0x5   :  { %p451_p0 = scmp.ne.s32.totalorder %s655_s1, %s450_s24  ;;  %p454_p1 = scmp.lt.u32.totalorder %s450_s24, %s655_s1 }
   0x7   :  { %p456_p2 = pnand %p454_p1, %p451_p0 }
   0x9   :  { %459 = shalt.err (!%p456_p2)
}
   0xa   :  { %s460_s29 = scalar_lea.vmem %s31_s19, 1024  ;;  %p465_p4 = scmp.lt.s32.totalorder %s31_s19, %s31_s19 }
   0xb   :  { %p461_p3 = scmp.ne.s32.totalorder %s31_s19, %s460_s29  ;;  %p466_p5 = scmp.lt.s32.totalorder %s460_s29, %s460_s29 }
   0xd   :  { %p467_p6 = por %p466_p5, %p465_p4 }
   0xf   :  { %p468_p7 = pnand %p467_p6, %p461_p3 }
  0x11   :  { %471 = shalt.err (!%p468_p7)
}
  0x12   :  { %s546_s30 = smov 64   ;;  %s547_s6 = smov 4  }
  0x13   :  { %36 = dma.hbm_to_vmem [thread:$0]  %s655_s1, 1024, %s31_s19, [#allocation6], %s546_s30, %s546_s30, %s547_s6  }
  0x14   :  { %s472_s11 = scalar_lea.hbm %s654_s0, 128 }
  0x15   :  { %p473_p8 = scmp.ne.s32.totalorder %s654_s0, %s472_s11  ;;  %p476_p9 = scmp.lt.u32.totalorder %s472_s11, %s654_s0 }
  0x17   :  { %p478_p10 = pnand %p476_p9, %p473_p8 }
  0x19   :  { %481 = shalt.err (!%p478_p10)
}
  0x1a   :  { %s482_s16 = scalar_lea.vmem %s584_s21, 128  ;;  %p487_p12 = scmp.lt.s32.totalorder %s584_s21, %s584_s21 }
  0x1b   :  { %p483_p11 = scmp.ne.s32.totalorder %s584_s21, %s482_s16  ;;  %p488_p13 = scmp.lt.s32.totalorder %s482_s16, %s482_s16 }
  0x1d   :  { %p489_p0 = por %p488_p13, %p487_p12 }
  0x1f   :  { %p490_p1 = pnand %p489_p0, %p483_p11 }
  0x21   :  { %493 = shalt.err (!%p490_p1)
}
  0x22   :  { %24 = dma.hbm_to_vmem [thread:$0]  %s654_s0, 128, %s584_s21, [#allocation3], %s546_s30, %s546_s30, %s547_s6  }
  0x23   :  { %s548_s18 = smov [#allocation7]   ;;  %s494_s23 = scalar_lea.hbm %s657_s3, 1024 }
  0x24   :  { %s44_s19 = sshll.u32 %s548_s18, 4  ;;  %p495_p2 = scmp.ne.s32.totalorder %s657_s3, %s494_s23  ;;  %s45_s19 = int_to_ptr.vmem [resolvable:$true] %s44_s19 }
  0x25   :  { %p498_p3 = scmp.lt.u32.totalorder %s494_s23, %s657_s3 }
  0x27   :  { %p500_p4 = pnand %p498_p3, %p495_p2 }
  0x29   :  { %503 = shalt.err (!%p500_p4)
}
  0x2a   :  { %s504_s28 = scalar_lea.vmem %s45_s19, 1024  ;;  %p509_p6 = scmp.lt.s32.totalorder %s45_s19, %s45_s19 }
  0x2b   :  { %p505_p5 = scmp.ne.s32.totalorder %s45_s19, %s504_s28  ;;  %p510_p7 = scmp.lt.s32.totalorder %s504_s28, %s504_s28 }
  0x2d   :  { %p511_p8 = por %p510_p7, %p509_p6 }
  0x2f   :  { %p512_p9 = pnand %p511_p8, %p505_p5 }
  0x31   :  { %515 = shalt.err (!%p512_p9)
}
  0x32   :  { %50 = dma.hbm_to_vmem [thread:$0]  %s657_s3, 1024, %s45_s19, [#allocation6], %s546_s30, %s546_s30, %s547_s6  }
  0x33   :  { %538 = dma.done.wait [#allocation3], 128  }
  0x34   :  { %539 = vsyncadd [#allocation3], 4294967168 }
  0x35   :  { %540 = dma.done.wait [#allocation6], 2048  }
  0x36   :  { %541 = vsyncadd [#allocation6], 4294965248  ;;  %v549_v0 = vmov 0.0   ;;  %vm550_vm0 = vmmov 0   ;;  %v429_v1 = vld [vmem:[#allocation5] sm:$0xff]   ;;  %v430_v2 = vld [vmem:[#allocation5 + $0x8] sm:$0xff]  }
  0x37   :  { %379 = vmatprep.subr.bf16.mxu0 %v549_v0  ;;  %395 = vmatprep.mubr.msk.bf16.mxu0 %vm550_vm0, %v549_v0  ;;  %v431_v3 = vld [vmem:[#allocation5 + $0x10] sm:$0xff]   ;;  %v438_v4 = vld [vmem:[#allocation7] sm:$0xff]   ;;  %v432_v5 = vld [vmem:[#allocation5 + $0x18] sm:$0xff]   ;;  %s551_s6 = smov [#allocation8]  }
  0x38   :  { %399 = vmatprep.subr.bf16.mxu1 %v549_v0  ;;  %415 = vmatprep.mubr.msk.bf16.mxu1 %vm550_vm0, %v549_v0  ;;  %v439_v6 = vld [vmem:[#allocation7 + $0x8] sm:$0xff]   ;;  %v433_v7 = vld [vmem:[#allocation5 + $0x20] sm:$0xff]   ;;  %v435_v9 = vld [vmem:[#allocation5 + $0x30] sm:$0xff]   ;;  %s329_s7 = sshll.u32 %s551_s6, 4  ;;  %s330_s7 = int_to_ptr.vmem [resolvable:$true] %s329_s7 }
  0x39   :  { %380 = vmatpush3.bf16.msra.mxu0 %v429_v1  ;;  %400 = vmatpush3.bf16.msra.mxu1 %v438_v4  ;;  %v434_v8 = vld [vmem:[#allocation5 + $0x28] sm:$0xff]   ;;  %v436_v10 = vld [vmem:[#allocation5 + $0x38] sm:$0xff]   ;;  %v440_v12 = vld [vmem:[#allocation7 + $0x10] sm:$0xff]   ;;  %s516_s8 = scalar_lea.vmem %s330_s7, 256  ;;  %p521_p11 = scmp.lt.s32.totalorder %s330_s7, %s330_s7 }
  0x3a   :  { %381 = vmatprep.subr.bf16.mxu0 %v549_v0  ;;  %401 = vmatprep.subr.bf16.mxu1 %v549_v0  ;;  %v437_v11 = vld [vmem:[#allocation2] sm:$0xff]   ;;  %v442_v14 = vld [vmem:[#allocation7 + $0x20] sm:$0xff]   ;;  %v443_v15 = vld [vmem:[#allocation7 + $0x28] sm:$0xff]   ;;  %p517_p10 = scmp.ne.s32.totalorder %s330_s7, %s516_s8  ;;  %p522_p12 = scmp.lt.s32.totalorder %s516_s8, %s516_s8 }
  0x3b   :  { %v441_v13 = vld [vmem:[#allocation7 + $0x18] sm:$0xff]   ;;  %v444_v16 = vld [vmem:[#allocation7 + $0x30] sm:$0xff]  }
  0x3c   :  { %v445_v17 = vld [vmem:[#allocation7 + $0x38] sm:$0xff]   ;;  %p523_p13 = por %p522_p12, %p521_p11 }
  0x3d   :  { %382 = vmatpush3.bf16.msra.mxu0 %v430_v2  ;;  %402 = vmatpush3.bf16.msra.mxu1 %v439_v6  ;;  %v342_v18 = vld [vmem:[%s656_s2] ss:$0 sm:$0xff] }
  0x3e   :  { %383 = vmatprep.subr.bf16.mxu0 %v549_v0  ;;  %403 = vmatprep.subr.bf16.mxu1 %v549_v0  ;;  %v360_v36 = vld [vmem:[%s658_s4] ss:$0 sm:$0xff]  ;;  %p524_p0 = pnand %p523_p13, %p517_p10 }
  0x41   :  { %384 = vmatpush3.bf16.msra.mxu0 %v431_v3  ;;  %404 = vmatpush3.bf16.msra.mxu1 %v440_v12 }
  0x42   :  { %385 = vmatprep.subr.bf16.mxu0 %v549_v0  ;;  %405 = vmatprep.subr.bf16.mxu1 %v549_v0 }
  0x45   :  { %386 = vmatpush3.bf16.msra.mxu0 %v432_v5  ;;  %406 = vmatpush3.bf16.msra.mxu1 %v441_v13 }
  0x46   :  { %387 = vmatprep.subr.bf16.mxu0 %v549_v0  ;;  %407 = vmatprep.subr.bf16.mxu1 %v549_v0 }
  0x49   :  { %388 = vmatpush3.bf16.msra.mxu0 %v433_v7  ;;  %408 = vmatpush3.bf16.msra.mxu1 %v442_v14 }
  0x4a   :  { %389 = vmatprep.subr.bf16.mxu0 %v549_v0  ;;  %409 = vmatprep.subr.bf16.mxu1 %v549_v0 }
  0x4d   :  { %390 = vmatpush3.bf16.msra.mxu0 %v434_v8  ;;  %410 = vmatpush3.bf16.msra.mxu1 %v443_v15 }
  0x4e   :  { %391 = vmatprep.subr.bf16.mxu0 %v549_v0  ;;  %411 = vmatprep.subr.bf16.mxu1 %v549_v0 }
  0x51   :  { %392 = vmatpush3.bf16.msra.mxu0 %v435_v9  ;;  %412 = vmatpush3.bf16.msra.mxu1 %v444_v16 }
  0x52   :  { %393 = vmatprep.subr.bf16.mxu0 %v549_v0  ;;  %413 = vmatprep.subr.bf16.mxu1 %v549_v0 }
  0x55   :  { %394 = vmatpush3.bf16.msra.mxu0 %v436_v10  ;;  %414 = vmatpush3.bf16.msra.mxu1 %v445_v17 }
  0x58   :  { %396 = vmatmul.mubr.bf16.vlgmr.msra.gmra.mrb[0].mxu0 %v437_v11 }
 0x12b   :  { %v176_v19 = vpop.f32.mrb[0].mxu0 }
 0x12c   :  { %v177_v20 = vadd.f32 %v342_v18, %v176_v19  ;;  %v397_v21 = vpop.f32.mrb[1].mxu0 }
 0x12d   :  { %v179_v22 = vpop.f32.mrb[2].mxu0 }
 0x12e   :  { %v185_v23 = vmul.f32 0.70710677, %v177_v20  ;;  %v180_v24 = vadd.f32 %v342_v18, %v179_v22  ;;  %v398_v25 = vpop.f32.mrb[3].mxu0  ;;  %v183_v30 = vmul.f32 0.5, %v177_v20 }
 0x130   :  { %446 = verf.f32 %v185_v23  ;;  %v186_v26 = vmul.f32 0.70710677, %v180_v24  ;;  %v184_v31 = vmul.f32 0.5, %v180_v24 }
 0x132   :  { %448 = verf.f32 %v186_v26 }
 0x13a   :  { %v447_v27 = vpop.eup %446 }
 0x13b   :  { %v189_v28 = vadd.f32 1.0, %v447_v27 }
 0x13c   :  { %v449_v29 = vpop.eup %448 }
 0x13d   :  { %v190_v32 = vadd.f32 1.0, %v449_v29  ;;  %v191_v33 = vmul.f32 %v189_v28, %v183_v30 }
 0x13f   :  { %v192_v34 = vmul.f32 %v190_v32, %v184_v31 }
 0x141   :  { %v193_v35 = vpack.c.bf16 %v192_v34, %v191_v33 }
 0x143   :  { %416 = vmatmul.mubr.bf16.vlgmr.msra.gmra.mrb[0].mxu1 %v193_v35 }
 0x216   :  { %v292_v37 = vpop.f32.mrb[0].mxu1 }
 0x217   :  { %v310_v38 = vadd.f32 %v360_v36, %v292_v37  ;;  %v417_v39 = vpop.f32.mrb[1].mxu1 }
 0x218   :  { %v295_v40 = vpop.f32.mrb[2].mxu1 }
 0x219   :  { %312 = vst [vmem:[#allocation8] sm:$0xff] %v310_v38  ;;  %v311_v41 = vadd.f32 %v360_v36, %v295_v40  ;;  %v418_v42 = vpop.f32.mrb[3].mxu1 }
 0x21b   :  { %313 = vst [vmem:[#allocation8 + $0x8] sm:$0xff] %v311_v41 }
 0x21c   :  { %527 = shalt.err (!%p524_p0)
}
 0x21d   :  { %s528_s10 = scalar_lea.hbm %s659_s5, 256 }
 0x21e   :  { %p529_p1 = scmp.ne.s32.totalorder %s659_s5, %s528_s10  ;;  %p532_p2 = scmp.lt.u32.totalorder %s528_s10, %s659_s5 }
 0x220   :  { %p534_p3 = pnand %p532_p2, %p529_p1 }
 0x222   :  { %537 = shalt.err (!%p534_p3)
}
 0x223   :  { %s552_s15 = smov 128   ;;  %s553_s16 = smov 8  }
 0x224   :  { %335 = dma.vmem_to_hbm [thread:$0]  %s330_s7, 256, %s659_s5, [#allocation4], %s552_s15, %s552_s15, %s553_s16  }
 0x225   :  { %542 = dma.done.wait [#allocation4], 256  }
 0x226   :  { %543 = vsyncadd [#allocation4], 4294967040 }
 0x227   :  { %339 = vsyncpa [#allocation3], 1 }
 0x228   :  { %340 = vsyncpa [#allocation6], 1 }
 0x229   :  { %341 = vsyncpa [#allocation4], 1 }

</bundles_post_ra>
